<compile_context>
chip_gen: v5e
topology: v5e:2x2
jax: 0.10.0
libtpu: 0.0.40
codegen_flags: <defaults>
</compile_context>

<pallas_src>
import functools

import jax
import jax.numpy as jnp
from jax.experimental import pallas as pl
from jax.experimental.pallas import tpu as pltpu


def _resblock_kernel_identity(x_ref, w1_ref, b1_ref, w2_ref, b2_ref, o_ref):
    """d_in == d_out: out = x + Conv2(ReLU(Conv1(x))). Blocks are (C, tl)."""
    x = x_ref[...]                                               # (d_in, tl)
    h = jnp.dot(w1_ref[...], x, preferred_element_type=jnp.float32) + b1_ref[...]
    h = jnp.maximum(h, 0.0)                                      # ReLU
    # Dropout(p=0.0) == identity
    p = jnp.dot(w2_ref[...], h, preferred_element_type=jnp.float32) + b2_ref[...]
    o_ref[...] = (x.astype(jnp.float32) + p).astype(o_ref.dtype)


def _resblock_kernel_downsample(x_ref, w1d_ref, b1d_ref, w2_ref, b2_ref, o_ref,
                                *, d_out):
    """d_in != d_out: out = Downsample(x) + Conv2(ReLU(Conv1(x))).

    w1d = concat([w1, wd], axis=0) : (2*d_out, d_in) -> a single MXU pass
    produces both the first projection and the downsample residual.
    """
    x = x_ref[...]                                               # (d_in, tl)
    hw = jnp.dot(w1d_ref[...], x, preferred_element_type=jnp.float32) + b1d_ref[...]
    h = jnp.maximum(hw[:d_out, :], 0.0)                          # first conv + ReLU
    res = hw[d_out:, :]                                          # downsample path
    p = jnp.dot(w2_ref[...], h, preferred_element_type=jnp.float32) + b2_ref[...]
    o_ref[...] = (res + p).astype(o_ref.dtype)


def _round_down_mult(x, m):
    return (x // m) * m


def _weight_spec(shape):
    """Grid-invariant operand: full-array block, constant index_map, single buffer."""
    idx_map = lambda n, j: (0,) * len(shape)
    try:
        return pl.BlockSpec(shape, idx_map, pipeline_mode=pl.Buffered(1))
    except TypeError:  # older BlockSpec signature without pipeline_mode
        return pl.BlockSpec(shape, idx_map)


def prepare_params(params):
    """One-time param fusion/reshaping (hoist out of the per-call / jitted path)."""
    d_out, d_in = params["w1"].shape
    prepared = dict(params)
    prepared["b1_col"] = params["b1"].reshape(d_out, 1)
    prepared["b2_col"] = params["b2"].reshape(d_out, 1)
    if d_in != d_out:
        prepared["w1d"] = jnp.concatenate([params["w1"], params["wd"]], axis=0)
        prepared["b1d_col"] = jnp.concatenate(
            [params["b1"], params["bd"]], axis=0).reshape(2 * d_out, 1)
    return prepared


def residual_block(x, params, *, tl_max=1024, vmem_limit_bytes=48 * 1024 * 1024):
    """x: (N, d_in, L). params weights are (out_channels, in_channels)."""
    N, C_in, L = x.shape
    d_out, d_in = params["w1"].shape
    assert C_in == d_in, "x dimension does not agree with d_in"
    downsample = d_in != d_out

    # Prefer calling prepare_params() once outside any jit; fall back lazily.
    if "b1_col" not in params or (downsample and "w1d" not in params):
        params = prepare_params(params)

    # Small-L lane packing: fold batch into the spatial/lane axis (1x1 conv is
    # per-position, so positions from different batch elements are independent).
    packed = (L < 128) and (N > 1)
    if packed:
        x_work = jnp.transpose(x, (1, 0, 2)).reshape(1, C_in, N * L)
    else:
        x_work = x
    N_w, _, L_w = x_work.shape

    itembytes = x.dtype.itemsize
    w_rows = 2 * d_out if downsample else d_out
    tl_max = max(128, _round_down_mult(tl_max, 128))

    # L-tile selection: lane-dense (multiple of 128) when possible, sized so
    # double-buffered x/out tiles + f32 temps stay within a conservative VMEM
    # budget (safe on v7x's 64 MiB as well as v5e/v6e).
    if L_w >= 128:
        col_bytes = 2 * (d_in + d_out) * itembytes + (w_rows + d_out) * 4
        stream_budget = 24 * 1024 * 1024
        tl_cap = max(128, _round_down_mult(stream_budget // col_bytes, 128))
        tl = min(tl_max, tl_cap, _round_down_mult(L_w, 128))
        num_l = pl.cdiv(L_w, tl)   # partial last tile handled by Pallas (no wrapper pad)
        # v7x has 2 TensorCores: ensure >= 2 parallel programs when data allows.
        if N_w * num_l < 2 and L_w >= 256:
            tl = max(128, ((pl.cdiv(L_w, 2) + 127) // 128) * 128)
            num_l = pl.cdiv(L_w, tl)
    else:
        tl = L_w                   # tiny spatial extent: single full-width block
        num_l = 1

    grid = (N_w, num_l)
    x_spec = pl.BlockSpec((None, d_in, tl), lambda n, j: (n, 0, j))
    out_spec = pl.BlockSpec((None, d_out, tl), lambda n, j: (n, 0, j))

    w2 = params["w2"]
    b2 = params["b2_col"]
    if downsample:
        kernel = functools.partial(_resblock_kernel_downsample, d_out=d_out)
        w1 = params["w1d"]
        b1 = params["b1d_col"]
    else:
        kernel = _resblock_kernel_identity
        w1 = params["w1"]
        b1 = params["b1_col"]

    operands = (x_work, w1, b1, w2, b2)
    in_specs = [x_spec, _weight_spec(w1.shape), _weight_spec(b1.shape),
                _weight_spec(w2.shape), _weight_spec(b2.shape)]

    out = pl.pallas_call(
        kernel,
        out_shape=jax.ShapeDtypeStruct((N_w, d_out, L_w), x.dtype),
        grid_spec=pltpu.PrefetchScalarGridSpec(
            num_scalar_prefetch=0,
            grid=grid,
            in_specs=in_specs,
            out_specs=out_spec,
        ),
        compiler_params=pltpu.CompilerParams(
            dimension_semantics=("parallel", "parallel"),
            vmem_limit_bytes=vmem_limit_bytes),
    )(*operands)

    if packed:
        out = jnp.transpose(out.reshape(d_out, N, L), (1, 0, 2))
    return out


def init_params(key, d_in, d_out):
    """Deterministic synthetic init. Weights stored as (out_channels, in_channels)."""
    ks = jax.random.split(key, 6)
    scale1 = 1.0 / jnp.sqrt(d_in)
    scale2 = 1.0 / jnp.sqrt(d_out)
    params = {
        "w1": jax.random.normal(ks[0], (d_out, d_in), jnp.float32) * scale1,
        "b1": jax.random.normal(ks[1], (d_out,), jnp.float32) * scale1,
        "w2": jax.random.normal(ks[2], (d_out, d_out), jnp.float32) * scale2,
        "b2": jax.random.normal(ks[3], (d_out,), jnp.float32) * scale2,
    }
    if d_in != d_out:
        params["wd"] = jax.random.normal(ks[4], (d_out, d_in), jnp.float32) * scale1
        params["bd"] = jax.random.normal(ks[5], (d_out,), jnp.float32) * scale1
    # Hoist the fused-weight concat / bias reshapes out of the per-call path.
    return prepare_params(params)


def residual_block_ref(x, params):
    """Plain-JAX reference mirroring the PyTorch forward (f32-accurate matmuls)."""
    d_out, d_in = params["w1"].shape
    h = jnp.einsum("oc,ncl->nol", params["w1"], x,
                   precision="highest") + params["b1"][None, :, None]
    h = jnp.maximum(h, 0.0)
    p = jnp.einsum("oc,ncl->nol", params["w2"], h,
                   precision="highest") + params["b2"][None, :, None]
    if d_in == d_out:
        res = x
    else:
        res = jnp.einsum("oc,ncl->nol", params["wd"], x,
                         precision="highest") + params["bd"][None, :, None]
    return res + p


if __name__ == "__main__":
    key = jax.random.PRNGKey(0)
    k_x, k_p1, k_p2, k_x3 = jax.random.split(key, 4)

    N, L = 2, 16

    # Case 1: d_in != d_out -> fused downsample residual, batch-packed small-L path.
    d_in, d_out = 32, 64
    x = jax.random.normal(k_x, (N, d_in, L), jnp.float32)
    params = init_params(k_p1, d_in, d_out)
    out = jax.block_until_ready(residual_block(x, params))
    ref = residual_block_ref(x, params)
    assert out.shape == (N, d_out, L)
    assert jnp.allclose(out, ref, rtol=1e-4, atol=1e-4)

    # Case 2: d_in == d_out -> identity residual path.
    d_eq = 32
    x2 = jax.random.normal(k_x, (N, d_eq, L), jnp.float32)
    params2 = init_params(k_p2, d_eq, d_eq)
    out2 = jax.block_until_ready(residual_block(x2, params2))
    ref2 = residual_block_ref(x2, params2)
    assert out2.shape == (N, d_eq, L)
    assert jnp.allclose(out2, ref2, rtol=1e-4, atol=1e-4)

    # Case 3: L not a multiple of 128 -> lane-dense 128-wide tiles with a masked
    # partial edge block (no wrapper pad / slice, no extra HBM traffic).
    L3 = 200
    x3 = jax.random.normal(k_x3, (N, d_in, L3), jnp.float32)
    out3 = jax.block_until_ready(residual_block(x3, params))
    ref3 = residual_block_ref(x3, params)
    assert out3.shape == (N, d_out, L3)
    assert jnp.allclose(out3, ref3, rtol=1e-4, atol=1e-4)

    # Case 4: N == 1, tiny L (no batch packing possible) still works.
    x4 = x[:1]
    out4 = jax.block_until_ready(residual_block(x4, params))
    ref4 = residual_block_ref(x4, params)
    assert out4.shape == (1, d_out, L)
    assert jnp.allclose(out4, ref4, rtol=1e-4, atol=1e-4)

    print("KERNEL_OK")
</pallas_src>

<mosaic_0001>
module attributes {stable_mosaic.version = 11 : i64} {
  func.func @_resblock_kernel_downsample(%arg0: i32, %arg1: i32, %arg2: memref<1x32x32xf32, #tpu.memory_space<vmem>>, %arg3: memref<128x32xf32, #tpu.memory_space<vmem>>, %arg4: memref<128x1xf32, #tpu.memory_space<vmem>>, %arg5: memref<64x64xf32, #tpu.memory_space<vmem>>, %arg6: memref<64x1xf32, #tpu.memory_space<vmem>>, %arg7: memref<1x64x32xf32, #tpu.memory_space<vmem>>) attributes {dimension_semantics = [#tpu.dimension_semantics<parallel>, #tpu.dimension_semantics<parallel>], iteration_bounds = array<i64: 1, 1>, scalar_prefetch = 0 : i64, scratch_operands = 0 : i64, tpu.core_type = #tpu.core_type<tc>, window_params = [{transform_indices = @transform_0, window_bounds = array<i64: 1, 32, 32>}, {pipeline_mode = #tpu.pipeline_mode<synchronous>, transform_indices = @transform_1, window_bounds = array<i64: 128, 32>}, {pipeline_mode = #tpu.pipeline_mode<synchronous>, transform_indices = @transform_2, window_bounds = array<i64: 128, 1>}, {pipeline_mode = #tpu.pipeline_mode<synchronous>, transform_indices = @transform_3, window_bounds = array<i64: 64, 64>}, {pipeline_mode = #tpu.pipeline_mode<synchronous>, transform_indices = @transform_4, window_bounds = array<i64: 64, 1>}, {transform_indices = @transform_5, window_bounds = array<i64: 1, 64, 32>}]} {
    %c0 = arith.constant 0 : index
    %c0_0 = arith.constant 0 : index
    %c0_1 = arith.constant 0 : index
    %0 = vector.load %arg2[%c0, %c0_0, %c0_1] : memref<1x32x32xf32, #tpu.memory_space<vmem>>, vector<1x32x32xf32>
    %1 = vector.shape_cast %0 : vector<1x32x32xf32> to vector<32x32xf32>
    %c0_2 = arith.constant 0 : index
    %c0_3 = arith.constant 0 : index
    %2 = vector.load %arg3[%c0_2, %c0_3] : memref<128x32xf32, #tpu.memory_space<vmem>>, vector<128x32xf32>
    %cst = arith.constant dense<0.000000e+00> : vector<128x32xf32>
    %3 = tpu.matmul %2, %1, %cst {dimension_numbers = #tpu.dot_dimension_numbers<[1], [0], [0], [1], [0, 0, 1, 1], [], []>} : vector<128x32xf32>, vector<32x32xf32>, vector<128x32xf32> -> vector<128x32xf32>
    %c0_4 = arith.constant 0 : index
    %c0_5 = arith.constant 0 : index
    %4 = vector.load %arg4[%c0_4, %c0_5] : memref<128x1xf32, #tpu.memory_space<vmem>>, vector<128x1xf32>
    %5 = vector.broadcast %4 : vector<128x1xf32> to vector<128x32xf32>
    %6 = arith.addf %3, %5 : vector<128x32xf32>
    %7 = vector.extract_strided_slice %6 {offsets = [0, 0], sizes = [64, 32], strides = [1, 1]} : vector<128x32xf32> to vector<64x32xf32>
    %cst_6 = arith.constant 0.000000e+00 : f32
    %8 = vector.broadcast %cst_6 : f32 to vector<64x32xf32>
    %9 = arith.maximumf %7, %8 : vector<64x32xf32>
    %10 = vector.extract_strided_slice %6 {offsets = [64, 0], sizes = [64, 32], strides = [1, 1]} : vector<128x32xf32> to vector<64x32xf32>
    %c0_7 = arith.constant 0 : index
    %c0_8 = arith.constant 0 : index
    %11 = vector.load %arg5[%c0_7, %c0_8] : memref<64x64xf32, #tpu.memory_space<vmem>>, vector<64x64xf32>
    %cst_9 = arith.constant dense<0.000000e+00> : vector<64x32xf32>
    %12 = tpu.matmul %11, %9, %cst_9 {dimension_numbers = #tpu.dot_dimension_numbers<[1], [0], [0], [1], [0, 0, 1, 1], [], []>} : vector<64x64xf32>, vector<64x32xf32>, vector<64x32xf32> -> vector<64x32xf32>
    %c0_10 = arith.constant 0 : index
    %c0_11 = arith.constant 0 : index
    %13 = vector.load %arg6[%c0_10, %c0_11] : memref<64x1xf32, #tpu.memory_space<vmem>>, vector<64x1xf32>
    %14 = vector.broadcast %13 : vector<64x1xf32> to vector<64x32xf32>
    %15 = arith.addf %12, %14 : vector<64x32xf32>
    %16 = arith.addf %10, %15 : vector<64x32xf32>
    %c0_12 = arith.constant 0 : index
    %c0_13 = arith.constant 0 : index
    %c0_14 = arith.constant 0 : index
    %17 = vector.load %arg7[%c0_12, %c0_13, %c0_14] : memref<1x64x32xf32, #tpu.memory_space<vmem>>, vector<1x64x32xf32>
    %18 = vector.shape_cast %17 : vector<1x64x32xf32> to vector<64x32xf32>
    %19 = vector.shape_cast %16 : vector<64x32xf32> to vector<1x64x32xf32>
    tpu.vector_store %arg7[%c0_12, %c0_13, %c0_14], %19 {strides = array<i32>} : memref<1x64x32xf32, #tpu.memory_space<vmem>>, vector<1x64x32xf32>,
    return
  }
  func.func @transform_0(%arg0: i32, %arg1: i32) -> (i32, i32, i32) {
    %c0_i32 = arith.constant 0 : i32
    %c0_i32_0 = arith.constant 0 : i32
    return %arg0, %c0_i32, %arg1 : i32, i32, i32
  }
  func.func @transform_1(%arg0: i32, %arg1: i32) -> (i32, i32) {
    %c0_i32 = arith.constant 0 : i32
    %c0_i32_0 = arith.constant 0 : i32
    %c0_i32_1 = arith.constant 0 : i32
    return %c0_i32, %c0_i32_0 : i32, i32
  }
  func.func @transform_2(%arg0: i32, %arg1: i32) -> (i32, i32) {
    %c0_i32 = arith.constant 0 : i32
    %c0_i32_0 = arith.constant 0 : i32
    %c0_i32_1 = arith.constant 0 : i32
    return %c0_i32, %c0_i32_0 : i32, i32
  }
  func.func @transform_3(%arg0: i32, %arg1: i32) -> (i32, i32) {
    %c0_i32 = arith.constant 0 : i32
    %c0_i32_0 = arith.constant 0 : i32
    %c0_i32_1 = arith.constant 0 : i32
    return %c0_i32, %c0_i32_0 : i32, i32
  }
  func.func @transform_4(%arg0: i32, %arg1: i32) -> (i32, i32) {
    %c0_i32 = arith.constant 0 : i32
    %c0_i32_0 = arith.constant 0 : i32
    %c0_i32_1 = arith.constant 0 : i32
    return %c0_i32, %c0_i32_0 : i32, i32
  }
  func.func @transform_5(%arg0: i32, %arg1: i32) -> (i32, i32, i32) {
    %c0_i32 = arith.constant 0 : i32
    %c0_i32_0 = arith.constant 0 : i32
    return %arg0, %c0_i32, %arg1 : i32, i32, i32
  }
}

</mosaic_0001>

<bundles_post_ra>
// kernel: tpu_custom_call.1
= control target key start
LH: loop header
LB: loop body
LE: loop exit
PB: predicated region body
PF: predicated region fallthrough
CT: control target
= control target key end

     0   :  { %v444_v0 = vmov 0   ;;  %vm136_vm0 = vcmask 261120   ;;  %vm314_vm1 = vcmask 523264   ;;  %s687_s2 = inlined_call_operand.vmem [shape: f32[128,1], index: 2, kind: input, shape index: {}]   ;;  %s688_s0 = inlined_call_operand.vmem [shape: f32[1,32,32], index: 0, kind: input, shape index: {}]   ;;  %s689_s1 = inlined_call_operand.vmem [shape: f32[128,32], index: 1, kind: input, shape index: {}]   ;;  %s690_s4 = inlined_call_operand.vmem [shape: f32[64,1], index: 4, kind: input, shape index: {}]   ;;  %s691_s3 = inlined_call_operand.vmem [shape: f32[64,64], index: 3, kind: input, shape index: {}]   ;;  %s692_s5 = inlined_call_operand.vmem [shape: f32[1,64,32], index: 5, kind: output, shape index: {}]  }
   0x1   :  { %442 = vset.pattern.permute.xlu1 %v444_v0  ;;  %441 = vset.pattern.permute.xlu0 %v444_v0  ;;  %v47_v1 = vld [vmem:[%s687_s2 + $0x38] sm:$0xff]  ;;  %v45_v2 = vld [vmem:[%s687_s2 + $0x28] sm:$0xff]  ;;  %v22_v4 = vld [vmem:[%s688_s0 + $0x10] sm:$0xff] }
   0x2   :  { %v23_v3 = vld [vmem:[%s688_s0 + $0x18] sm:$0xff]  ;;  %93 = vperm.xlu0 %441, %v47_v1   ;;  %83 = vperm.xlu1 %442, %v45_v2   ;;  %v21_v5 = vld [vmem:[%s688_s0 + $0x8] sm:$0xff]  ;;  %v20_v6 = vld [vmem:[%s688_s0] sm:$0xff] }
   0x3   :  { %197 = vmatpush.msra.mxu0 %v23_v3  ;;  %424 = vmatpush.msra.mxu2 %v23_v3  ;;  %v24_v7 = vld [vmem:[%s689_s1] sm:$0xff]  ;;  %v30_v8 = vld [vmem:[%s689_s1 + $0x30] sm:$0xff]  ;;  %v43_v9 = vld [vmem:[%s687_s2 + $0x18] sm:$0xff] }
   0x4   :  { %425 = vmatpush.msra.mxu3 %v23_v3  ;;  %443 = vset.pattern.permute.xlu2 %v444_v0  ;;  %v46_v10 = vld [vmem:[%s687_s2 + $0x30] sm:$0xff]  ;;  %v44_v11 = vld [vmem:[%s687_s2 + $0x20] sm:$0xff]  ;;  %v37_v12 = vld [vmem:[%s689_s1 + $0x68] sm:$0xff] }
   0x5   :  { %198 = vmatpush.msra.mxu0 %v22_v4  ;;  %426 = vmatpush.msra.mxu2 %v22_v4  ;;  %v42_v13 = vld [vmem:[%s687_s2 + $0x10] sm:$0xff]  ;;  %v25_v14 = vld [vmem:[%s689_s1 + $0x8] sm:$0xff]  ;;  %v31_v15 = vld [vmem:[%s689_s1 + $0x38] sm:$0xff] }
   0x6   :  { %427 = vmatpush.msra.mxu3 %v22_v4  ;;  %73 = vperm.xlu2 %443, %v43_v9   ;;  %v41_v16 = vld [vmem:[%s687_s2 + $0x8] sm:$0xff]  ;;  %v40_v17 = vld [vmem:[%s687_s2] sm:$0xff]  ;;  %v38_v18 = vld [vmem:[%s689_s1 + $0x70] sm:$0xff] }
   0x7   :  { %199 = vmatpush.msra.mxu0 %v21_v5  ;;  %428 = vmatpush.msra.mxu2 %v21_v5  ;;  %v48_v19 = vld [vmem:[%s687_s2 + $0x40] sm:$0xff]  ;;  %v26_v20 = vld [vmem:[%s689_s1 + $0x10] sm:$0xff]  ;;  %v49_v22 = vld [vmem:[%s687_s2 + $0x48] sm:$0xff] }
   0x8   :  { %429 = vmatpush.msra.mxu3 %v21_v5  ;;  %v32_v21 = vld [vmem:[%s689_s1 + $0x40] sm:$0xff]  ;;  %v50_v23 = vld [vmem:[%s687_s2 + $0x50] sm:$0xff]  ;;  %v39_v24 = vld [vmem:[%s689_s1 + $0x78] sm:$0xff] }
   0x9   :  { %200 = vmatpush.msra.mxu0 %v20_v6  ;;  %430 = vmatpush.msra.mxu2 %v20_v6  ;;  %v51_v25 = vld [vmem:[%s687_s2 + $0x58] sm:$0xff]  ;;  %v33_v27 = vld [vmem:[%s689_s1 + $0x48] sm:$0xff]  ;;  %v52_v28 = vld [vmem:[%s687_s2 + $0x60] sm:$0xff] }
   0xa   :  { %400 = vmatmul.msk.f32.vlgmr.msra.gmra.mxu0 %vm136_vm0, %v24_v7  ;;  %406 = vmatmul.msk.f32.vlgmr.msra.gmra.mxu2 %vm136_vm0, %v30_v8  ;;  %v27_v26 = vld [vmem:[%s689_s1 + $0x18] sm:$0xff]  ;;  %v53_v29 = vld [vmem:[%s687_s2 + $0x68] sm:$0xff]  ;;  %v54_v30 = vld [vmem:[%s687_s2 + $0x70] sm:$0xff] }
   0xb   :  { %88 = vperm.xlu0 %441, %v46_v10   ;;  %78 = vperm.xlu1 %442, %v44_v11   ;;  %v28_v31 = vld [vmem:[%s689_s1 + $0x20] sm:$0xff]  ;;  %v34_v32 = vld [vmem:[%s689_s1 + $0x50] sm:$0xff]  ;;  %v55_v33 = vld [vmem:[%s687_s2 + $0x78] sm:$0xff] }
   0xc   :  { %431 = vmatpush.msra.mxu3 %v20_v6  ;;  %v266_v34 = vld [vmem:[%s690_s4] sm:$0xff]  ;;  %v267_v35 = vld [vmem:[%s690_s4 + $0x8] sm:$0xff]  ;;  %v35_v37 = vld [vmem:[%s689_s1 + $0x58] sm:$0xff] }
   0xd   :  { %413 = vmatmul.msk.f32.vlgmr.msra.gmra.mxu3 %vm136_vm0, %v37_v12  ;;  %v29_v36 = vld [vmem:[%s689_s1 + $0x28] sm:$0xff]  ;;  %v268_v38 = vld [vmem:[%s690_s4 + $0x10] sm:$0xff]  ;;  %v269_v39 = vld [vmem:[%s690_s4 + $0x18] sm:$0xff] }
   0xe   :  { %68 = vperm.xlu2 %443, %v42_v13   ;;  %v270_v40 = vld [vmem:[%s690_s4 + $0x20] sm:$0xff]  ;;  %v271_v42 = vld [vmem:[%s690_s4 + $0x28] sm:$0xff]  ;;  %v272_v43 = vld [vmem:[%s690_s4 + $0x30] sm:$0xff] }
   0xf   :  { %v36_v41 = vld [vmem:[%s689_s1 + $0x60] sm:$0xff]  ;;  %v273_v44 = vld [vmem:[%s690_s4 + $0x38] sm:$0xff] }
  0x10   :  { %v258_v13 = vld [vmem:[%s691_s3] sm:$0xff] }
  0x12   :  { %401 = vmatmul.msk.f32.gmra.mxu0 %vm136_vm0, %v25_v14  ;;  %407 = vmatmul.msk.f32.gmra.mxu2 %vm136_vm0, %v31_v15  ;;  %v264_v14 = vld [vmem:[%s691_s3 + $0x30] sm:$0xff]  ;;  %v259_v15 = vld [vmem:[%s691_s3 + $0x8] sm:$0xff] }
  0x13   :  { %63 = vperm.xlu0 %441, %v41_v16   ;;  %58 = vperm.xlu1 %442, %v40_v17   ;;  %v265_v16 = vld [vmem:[%s691_s3 + $0x38] sm:$0xff]  ;;  %v260_v17 = vld [vmem:[%s691_s3 + $0x10] sm:$0xff] }
  0x15   :  { %414 = vmatmul.msk.f32.gmra.mxu3 %vm136_vm0, %v38_v18  ;;  %v261_v18 = vld [vmem:[%s691_s3 + $0x18] sm:$0xff] }
  0x16   :  { %98 = vperm.xlu2 %443, %v48_v19   ;;  %v262_v19 = vld [vmem:[%s691_s3 + $0x20] sm:$0xff] }
  0x1a   :  { %402 = vmatmul.msk.f32.gmra.mxu0 %vm136_vm0, %v26_v20  ;;  %408 = vmatmul.msk.f32.gmra.mxu2 %vm136_vm0, %v32_v21  ;;  %v263_v20 = vld [vmem:[%s691_s3 + $0x28] sm:$0xff] }
  0x1b   :  { %103 = vperm.xlu0 %441, %v49_v22   ;;  %108 = vperm.xlu1 %442, %v50_v23  }
  0x1d   :  { %415 = vmatmul.msk.f32.gmra.mxu3 %vm136_vm0, %v39_v24 }
  0x1e   :  { %113 = vperm.xlu2 %443, %v51_v25  }
  0x22   :  { %403 = vmatmul.msk.f32.gmra.mxu0 %vm136_vm0, %v27_v26  ;;  %409 = vmatmul.msk.f32.gmra.mxu2 %vm136_vm0, %v33_v27 }
  0x23   :  { %118 = vperm.xlu0 %441, %v52_v28   ;;  %123 = vperm.xlu1 %442, %v53_v29  }
  0x26   :  { %128 = vperm.xlu2 %443, %v54_v30  }
  0x2a   :  { %404 = vmatmul.msk.f32.gmra.mxu0 %vm136_vm0, %v28_v31  ;;  %410 = vmatmul.msk.f32.gmra.mxu2 %vm136_vm0, %v34_v32 }
  0x2b   :  { %133 = vperm.xlu0 %441, %v55_v33   ;;  %276 = vperm.xlu1 %442, %v266_v34  }
  0x2e   :  { %281 = vperm.xlu2 %443, %v267_v35  }
  0x32   :  { %405 = vmatmul.msk.f32.gmra.mxu0 %vm136_vm0, %v29_v36  ;;  %411 = vmatmul.msk.f32.gmra.mxu2 %vm136_vm0, %v35_v37 }
  0x33   :  { %286 = vperm.xlu0 %441, %v268_v38   ;;  %291 = vperm.xlu1 %442, %v269_v39  }
  0x36   :  { %296 = vperm.xlu2 %443, %v270_v40  }
  0x3a   :  { %412 = vmatmul.msk.f32.gmra.mxu2 %vm136_vm0, %v36_v41 }
  0x3b   :  { %301 = vperm.xlu0 %441, %v271_v42   ;;  %306 = vperm.xlu1 %442, %v272_v43  }
  0x3e   :  { %311 = vperm.xlu2 %443, %v273_v44  }
  0x60   :  { %v74_v59 = vpop.permute.xlu2 %73 }
  0x68   :  { %v69_v2 = vpop.permute.xlu2 %68 }
  0x70   :  { %v99_v21 = vpop.permute.xlu2 %98 }
  0x74   :  { %v94_v46 = vpop.permute.xlu0 %93  ;;  %v84_v57 = vpop.permute.xlu1 %83 }
  0x78   :  { %v114_v23 = vpop.permute.xlu2 %113 }
  0x7d   :  { %v89_v49 = vpop.permute.xlu0 %88  ;;  %v79_v60 = vpop.permute.xlu1 %78 }
  0x80   :  { %v129_v26 = vpop.permute.xlu2 %128 }
  0x85   :  { %v64_v5 = vpop.permute.xlu0 %63  ;;  %v59_v8 = vpop.permute.xlu1 %58 }
  0x87   :  { %v202_v45 = vpop.f32.mrf.mxu0 }
  0x88   :  { %v203_v9 = vadd.f32 %v202_v45, %v59_v8  ;;  %v282_v31 = vpop.permute.xlu2 %281 }
  0x8a   :  { %v250_v12 = vmax.f32 %v203_v9, 0.0 }
  0x8d   :  { %v220_v47 = vpop.f32.mrf.mxu2  ;;  %v109_v22 = vpop.permute.xlu1 %108 }
  0x8e   :  { %v221_v50 = vadd.f32 %v220_v47, %v89_v49  ;;  %v104_v27 = vpop.permute.xlu0 %103 }
  0x8f   :  { %v205_v48 = vpop.f32.mrf.mxu0 }
  0x90   :  { %v256_v54 = vmax.f32 %v221_v50, 0.0  ;;  %v206_v6 = vadd.f32 %v205_v48, %v64_v5  ;;  %v241_v25 = vpop.f32.mrf.mxu3  ;;  %v297_v40 = vpop.permute.xlu2 %296 }
  0x92   :  { %v251_v11 = vmax.f32 %v206_v6, 0.0 }
  0x95   :  { %v223_v51 = vpop.f32.mrf.mxu2  ;;  %v124_v24 = vpop.permute.xlu1 %123 }
  0x96   :  { %v224_v52 = vadd.f32 %v223_v51, %v94_v46  ;;  %v119_v32 = vpop.permute.xlu0 %118 }
  0x97   :  { %v208_v53 = vpop.f32.mrf.mxu0 }
  0x98   :  { %v257_v55 = vmax.f32 %v224_v52, 0.0  ;;  %v209_v3 = vadd.f32 %v208_v53, %v69_v2  ;;  %v244_v29 = vpop.f32.mrf.mxu3  ;;  %v312_v52 = vpop.permute.xlu2 %311 }
  0x99   :  { %v245_v44 = vadd.f32 %v244_v29, %v129_v26 }
  0x9a   :  { %347 = vmatpush.msra.mxu1 %v257_v55  ;;  %432 = vmatpush.msrb.mxu3 %v257_v55  ;;  %v252_v10 = vmax.f32 %v209_v3, 0.0 }
  0x9c   :  { %348 = vmatpush.msra.mxu1 %v256_v54  ;;  %433 = vmatpush.msrb.mxu3 %v256_v54 }
  0x9d   :  { %v277_v28 = vpop.permute.xlu1 %276  ;;  %v226_v30 = vpop.f32.mrf.mxu2 }
  0x9e   :  { %v227_v37 = vadd.f32 %v226_v30, %v99_v21  ;;  %v134_v41 = vpop.permute.xlu0 %133 }
  0x9f   :  { %v211_v56 = vpop.f32.mrf.mxu0 }
  0xa0   :  { %v212_v0 = vadd.f32 %v211_v56, %v74_v59  ;;  %v247_v34 = vpop.f32.mrf.mxu3 }
  0xa1   :  { %v248_v54 = vadd.f32 %v247_v34, %v134_v41 }
  0xa2   :  { %v253_v7 = vmax.f32 %v212_v0, 0.0 }
  0xa5   :  { %v292_v33 = vpop.permute.xlu1 %291  ;;  %v229_v35 = vpop.f32.mrf.mxu2 }
  0xa6   :  { %v230_v47 = vadd.f32 %v229_v35, %v104_v27  ;;  %v287_v56 = vpop.permute.xlu0 %286 }
  0xa7   :  { %v214_v58 = vpop.f32.mrf.mxu0 }
  0xa8   :  { %v215_v62 = vadd.f32 %v214_v58, %v79_v60 }
  0xaa   :  { %v254_v4 = vmax.f32 %v215_v62, 0.0 }
  0xad   :  { %v307_v42 = vpop.permute.xlu1 %306  ;;  %v232_v50 = vpop.f32.mrf.mxu2 }
  0xae   :  { %v233_v58 = vadd.f32 %v232_v50, %v109_v22  ;;  %v302_v8 = vpop.permute.xlu0 %301 }
  0xaf   :  { %v217_v61 = vpop.f32.mrf.mxu0 }
  0xb0   :  { %v218_v63 = vadd.f32 %v217_v61, %v84_v57 }
  0xb2   :  { %v255_v1 = vmax.f32 %v218_v63, 0.0 }
  0xb4   :  { %349 = vmatpush.msra.mxu1 %v255_v1  ;;  %434 = vmatpush.msrb.mxu3 %v255_v1 }
  0xb5   :  { %v235_v62 = vpop.f32.mrf.mxu2 }
  0xb6   :  { %350 = vmatpush.msra.mxu1 %v254_v4  ;;  %435 = vmatpush.msrb.mxu3 %v254_v4  ;;  %v236_v0 = vadd.f32 %v235_v62, %v114_v23 }
  0xb8   :  { %351 = vmatpush.msra.mxu1 %v253_v7  ;;  %436 = vmatpush.msrb.mxu3 %v253_v7 }
  0xba   :  { %352 = vmatpush.msra.mxu1 %v252_v10  ;;  %437 = vmatpush.msrb.mxu3 %v252_v10  ;;  %v242_v10 = vadd.f32 %v241_v25, %v124_v24 }
  0xbc   :  { %353 = vmatpush.msra.mxu1 %v251_v11  ;;  %438 = vmatpush.msrb.mxu3 %v251_v11 }
  0xbd   :  { %v238_v3 = vpop.f32.mrf.mxu2 }
  0xbe   :  { %354 = vmatpush.msra.mxu1 %v250_v12  ;;  %439 = vmatpush.msrb.mxu3 %v250_v12  ;;  %v239_v5 = vadd.f32 %v238_v3, %v119_v32 }
  0xbf   :  { %416 = vmatmul.msk.f32.vlgmr.msra.gmra.mxu1 %vm314_vm1, %v258_v13  ;;  %422 = vmatmul.msk.f32.vlgmr.msrb.gmra.mxu3 %vm314_vm1, %v264_v14 }
  0xc7   :  { %417 = vmatmul.msk.f32.gmra.mxu1 %vm314_vm1, %v259_v15  ;;  %423 = vmatmul.msk.f32.gmra.mxu3 %vm314_vm1, %v265_v16 }
  0xcf   :  { %418 = vmatmul.msk.f32.gmra.mxu1 %vm314_vm1, %v260_v17 }
  0xd7   :  { %419 = vmatmul.msk.f32.gmra.mxu1 %vm314_vm1, %v261_v18 }
  0xdf   :  { %420 = vmatmul.msk.f32.gmra.mxu1 %vm314_vm1, %v262_v19 }
  0xe7   :  { %421 = vmatmul.msk.f32.gmra.mxu1 %vm314_vm1, %v263_v20 }
 0x13c   :  { %v356_v36 = vpop.f32.mrf.mxu1 }
 0x13d   :  { %v357_v38 = vadd.f32 %v356_v36, %v277_v28 }
 0x13f   :  { %v380_v39 = vadd.f32 %v357_v38, %v227_v37 }
 0x141   :  { %388 = vst.msk [vmem:[%s692_s5] sm:$0xff] %vm136_vm0, %v380_v39 }
 0x142   :  { %v374_v43 = vpop.f32.mrf.mxu3 }
 0x143   :  { %v375_v45 = vadd.f32 %v374_v43, %v307_v42 }
 0x144   :  { %v359_v46 = vpop.f32.mrf.mxu1 }
 0x145   :  { %v386_v48 = vadd.f32 %v375_v45, %v245_v44  ;;  %v360_v49 = vadd.f32 %v359_v46, %v282_v31 }
 0x147   :  { %394 = vst.msk [vmem:[%s692_s5 + $0x30] sm:$0xff] %vm136_vm0, %v386_v48  ;;  %v381_v51 = vadd.f32 %v360_v49, %v230_v47 }
 0x149   :  { %389 = vst.msk [vmem:[%s692_s5 + $0x8] sm:$0xff] %vm136_vm0, %v381_v51 }
 0x14a   :  { %v377_v53 = vpop.f32.mrf.mxu3 }
 0x14b   :  { %v378_v55 = vadd.f32 %v377_v53, %v312_v52 }
 0x14c   :  { %v362_v57 = vpop.f32.mrf.mxu1 }
 0x14d   :  { %v387_v59 = vadd.f32 %v378_v55, %v248_v54  ;;  %v363_v60 = vadd.f32 %v362_v57, %v287_v56 }
 0x14f   :  { %395 = vst.msk [vmem:[%s692_s5 + $0x38] sm:$0xff] %vm136_vm0, %v387_v59  ;;  %v382_v61 = vadd.f32 %v363_v60, %v233_v58 }
 0x151   :  { %390 = vst.msk [vmem:[%s692_s5 + $0x10] sm:$0xff] %vm136_vm0, %v382_v61 }
 0x154   :  { %v365_v63 = vpop.f32.mrf.mxu1 }
 0x155   :  { %v366_v1 = vadd.f32 %v365_v63, %v292_v33 }
 0x157   :  { %v383_v2 = vadd.f32 %v366_v1, %v236_v0 }
 0x159   :  { %391 = vst.msk [vmem:[%s692_s5 + $0x18] sm:$0xff] %vm136_vm0, %v383_v2 }
 0x15c   :  { %v368_v4 = vpop.f32.mrf.mxu1 }
 0x15d   :  { %v369_v6 = vadd.f32 %v368_v4, %v297_v40 }
 0x15f   :  { %v384_v7 = vadd.f32 %v369_v6, %v239_v5 }
 0x161   :  { %392 = vst.msk [vmem:[%s692_s5 + $0x20] sm:$0xff] %vm136_vm0, %v384_v7 }
 0x164   :  { %v371_v9 = vpop.f32.mrf.mxu1 }
 0x165   :  { %v372_v11 = vadd.f32 %v371_v9, %v302_v8 }
 0x167   :  { %v385_v12 = vadd.f32 %v372_v11, %v242_v10 }
 0x169   :  { %393 = vst.msk [vmem:[%s692_s5 + $0x28] sm:$0xff] %vm136_vm0, %v385_v12 }

</bundles_post_ra>
